<compile_context>
chip_gen: v7x
topology: tpu7x:2x2x1
jax: 0.10.0
libtpu: 0.0.40
codegen_flags: <defaults>
</compile_context>

<pallas_src>
import math

import jax
import jax.numpy as jnp
from jax.experimental import pallas as pl
from jax.experimental.pallas import tpu as pltpu


def _modulate_kernel(s_ref, t_ref, x_ref, o_ref):
    # s/t: (c_tile, 1) f32 columns; x/o: (c_tile, hw_tile) in x's dtype.
    # Compute in f32 regardless of x dtype (free; op is HBM-bound), cast only
    # on the store.
    x = x_ref[...].astype(jnp.float32)
    o_ref[...] = (x * s_ref[...] + t_ref[...]).astype(o_ref.dtype)


def _pick_tiles(batch, c_dim, hw_dim, itemsize, tile_bytes, min_steps=4):
    """Pick (c_tile, hw_tile): lane-dense, dtype-aligned, VMEM-bounded tiles."""
    lane = 128
    sub = max(8, 32 // max(int(itemsize), 1))        # 8 f32 / 16 bf16 / 32 int8
    budget = max(tile_bytes // max(int(itemsize), 1), sub * lane)  # elems/tile

    # Lane (HW) tile: full dim when HW < 128 (tiny maps; masked stores are
    # acceptable), else a multiple of 128 <= HW, capped so that at least `sub`
    # sublanes still fit in the byte budget.
    if hw_dim <= lane:
        hw_tile = hw_dim
    else:
        hw_cap = max(lane, (budget // sub) // lane * lane)
        hw_tile = min((hw_dim // lane) * lane, hw_cap)

    # Sublane (C) tile from the remaining budget; full dim is always legal.
    c_cap = max(sub, (budget // hw_tile) // sub * sub)
    c_tile = c_dim if c_dim <= c_cap else c_cap

    # Megacore guard: ensure >= min_steps grid steps so the "parallel" axes can
    # shard across both TensorCores (v7x) instead of leaving one idle.
    def steps(ct, ht):
        return batch * pl.cdiv(c_dim, ct) * pl.cdiv(hw_dim, ht)

    while steps(c_tile, hw_tile) < min_steps:
        if hw_tile >= 2 * lane:
            hw_tile = ((hw_tile // 2 + lane - 1) // lane) * lane
        elif c_tile >= 2 * sub:
            c_tile = ((c_tile // 2 + sub - 1) // sub) * sub
        else:
            break  # tensor is tiny; nothing useful left to split
    return c_tile, hw_tile


def generator_textural_modulation(x, texture, params):
    """x: (B, C_out, H, W) NCHW.  texture: (B, C_in)."""
    assert texture.ndim == 2, "only the texture.ndim == 2 branch is implemented"
    B, C_out, H, W = x.shape
    C_in = texture.shape[1]
    HW = H * W
    lin_scale = 1.0 / math.sqrt(C_in)  # EqualLinear weight scale (lr_mul = 1)

    # ---- Tiny fused EqualLinear pair: one (B, C_in) @ (C_in, 2*C_out) GEMM in
    # the wrapper (XLA handles it; avoids a serialized extra Pallas launch).
    w_cat = jnp.concatenate([params["scale_w"], params["bias_w"]], axis=0)  # (2C, C_in)
    b_cat = jnp.concatenate([params["scale_b"], params["bias_b"]], axis=0)  # (2C,)
    st = (texture.astype(jnp.float32)
          @ (w_cat.astype(jnp.float32).T * lin_scale)
          + b_cat.astype(jnp.float32))                                      # (B, 2C)
    # Column layout (B, C_out, 1) so the modulate kernel broadcasts along the
    # HW lane axis with no in-kernel transpose.  Tiny (B*C_out elements).
    s3 = st[:, :C_out, None]
    t3 = st[:, C_out:, None]

    # ---- Elementwise modulation; x kept in native NCHW(-flattened) layout.
    x3 = x.reshape(B, C_out, HW)     # layout-preserving, free

    # Generation-aware VMEM budget: 96 MiB limit / 16 MiB tiles on v5e/v6e
    # (128 MiB VMEM); conservative 48 MiB / 8 MiB on v7x (64 MiB per core) or
    # if the query fails.  4 big buffers (x+out double-buffered) stay < 2/3 of
    # the limit.
    try:
        vmem_cap = int(pltpu.get_tpu_info().vmem_capacity_bytes)
    except Exception:
        vmem_cap = 64 * 1024 * 1024
    if vmem_cap >= 128 * 1024 * 1024:
        vmem_limit, tile_bytes = 96 * 1024 * 1024, 16 * 1024 * 1024
    else:
        vmem_limit, tile_bytes = 48 * 1024 * 1024, 8 * 1024 * 1024

    c_tile, hw_tile = _pick_tiles(B, C_out, HW, x.dtype.itemsize, tile_bytes)
    grid = (B, pl.cdiv(C_out, c_tile), pl.cdiv(HW, hw_tile))

    out3 = pl.pallas_call(
        _modulate_kernel,
        out_shape=jax.ShapeDtypeStruct((B, C_out, HW), x.dtype),
        grid=grid,
        in_specs=[
            pl.BlockSpec((None, c_tile, 1), lambda b, c, h: (b, c, 0)),        # s
            pl.BlockSpec((None, c_tile, 1), lambda b, c, h: (b, c, 0)),        # t
            pl.BlockSpec((None, c_tile, hw_tile), lambda b, c, h: (b, c, h)),  # x
        ],
        out_specs=pl.BlockSpec((None, c_tile, hw_tile), lambda b, c, h: (b, c, h)),
        compiler_params=pltpu.CompilerParams(
            dimension_semantics=("parallel", "parallel", "parallel"),
            vmem_limit_bytes=vmem_limit),
    )(s3, t3, x3)

    return out3.reshape(B, C_out, H, W)


def reference_forward(x, texture, params):
    """Pure-JAX reference mirroring the PyTorch module (texture.ndim == 2)."""
    c_in = texture.shape[1]
    lin_scale = 1.0 / math.sqrt(c_in)
    tex = texture.astype(jnp.float32)
    s = tex @ (params["scale_w"].astype(jnp.float32) * lin_scale).T \
        + params["scale_b"].astype(jnp.float32)
    t = tex @ (params["bias_w"].astype(jnp.float32) * lin_scale).T \
        + params["bias_b"].astype(jnp.float32)
    out = x.astype(jnp.float32) * s[:, :, None, None] + t[:, :, None, None]
    return out.astype(x.dtype)


if __name__ == "__main__":
    def make_case(key, B, C_in, C_out, H, W, dtype):
        kx, kt, kw1, kb1, kw2, kb2 = jax.random.split(key, 6)
        x = jax.random.normal(kx, (B, C_out, H, W), dtype=jnp.float32).astype(dtype)
        texture = jax.random.normal(kt, (B, C_in), dtype=jnp.float32)
        params = {
            "scale_w": jax.random.normal(kw1, (C_out, C_in), dtype=jnp.float32),
            "scale_b": 0.1 * jax.random.normal(kb1, (C_out,), dtype=jnp.float32),
            "bias_w": jax.random.normal(kw2, (C_out, C_in), dtype=jnp.float32),
            "bias_b": 0.1 * jax.random.normal(kb2, (C_out,), dtype=jnp.float32),
        }
        return x, texture, params

    k1, k2, k3 = jax.random.split(jax.random.PRNGKey(0), 3)
    cases = [
        # (key, B, C_in, C_out, H, W, dtype, atol, rtol)
        (k1, 2, 8, 4, 16, 16, jnp.float32, 1e-5, 1e-5),    # primary small case
        (k2, 2, 8, 6, 10, 10, jnp.float32, 1e-5, 1e-5),    # non-128-aligned HW / odd C
        (k3, 1, 8, 4, 16, 16, jnp.bfloat16, 1.5e-1, 5e-2),  # bf16 x, f32 compute
    ]

    for key, B, C_in, C_out, H, W, dtype, atol, rtol in cases:
        x, texture, params = make_case(key, B, C_in, C_out, H, W, dtype)
        out = jax.block_until_ready(generator_textural_modulation(x, texture, params))
        ref = reference_forward(x, texture, params)
        assert out.shape == ref.shape == (B, C_out, H, W)
        assert out.dtype == x.dtype
        ok = jnp.allclose(out.astype(jnp.float32), ref.astype(jnp.float32),
                          atol=atol, rtol=rtol)
        assert bool(ok), (str(dtype),
                          float(jnp.max(jnp.abs(out.astype(jnp.float32)
                                                - ref.astype(jnp.float32)))))

    print("KERNEL_OK")
</pallas_src>

<mosaic_0001>
module attributes {stable_mosaic.version = 11 : i64} {
  func.func @_modulate_kernel(%arg0: i32, %arg1: i32, %arg2: i32, %arg3: memref<1x4x1xf32, #tpu.memory_space<vmem>>, %arg4: memref<1x4x1xf32, #tpu.memory_space<vmem>>, %arg5: memref<1x4x128xf32, #tpu.memory_space<vmem>>, %arg6: memref<1x4x128xf32, #tpu.memory_space<vmem>>) attributes {dimension_semantics = [#tpu.dimension_semantics<parallel>, #tpu.dimension_semantics<parallel>, #tpu.dimension_semantics<parallel>], iteration_bounds = array<i64: 2, 1, 2>, scalar_prefetch = 0 : i64, scratch_operands = 0 : i64, tpu.core_type = #tpu.core_type<tc>, window_params = [{transform_indices = @transform_0, window_bounds = array<i64: 1, 4, 1>}, {transform_indices = @transform_1, window_bounds = array<i64: 1, 4, 1>}, {transform_indices = @transform_2, window_bounds = array<i64: 1, 4, 128>}, {transform_indices = @transform_3, window_bounds = array<i64: 1, 4, 128>}]} {
    %c0 = arith.constant 0 : index
    %c0_0 = arith.constant 0 : index
    %c0_1 = arith.constant 0 : index
    %0 = vector.load %arg5[%c0, %c0_0, %c0_1] : memref<1x4x128xf32, #tpu.memory_space<vmem>>, vector<1x4x128xf32>
    %1 = vector.shape_cast %0 : vector<1x4x128xf32> to vector<4x128xf32>
    %c0_2 = arith.constant 0 : index
    %c0_3 = arith.constant 0 : index
    %c0_4 = arith.constant 0 : index
    %2 = vector.load %arg3[%c0_2, %c0_3, %c0_4] : memref<1x4x1xf32, #tpu.memory_space<vmem>>, vector<1x4x1xf32>
    %3 = vector.shape_cast %2 : vector<1x4x1xf32> to vector<4x1xf32>
    %4 = vector.broadcast %3 : vector<4x1xf32> to vector<4x128xf32>
    %5 = arith.mulf %1, %4 : vector<4x128xf32>
    %c0_5 = arith.constant 0 : index
    %c0_6 = arith.constant 0 : index
    %c0_7 = arith.constant 0 : index
    %6 = vector.load %arg4[%c0_5, %c0_6, %c0_7] : memref<1x4x1xf32, #tpu.memory_space<vmem>>, vector<1x4x1xf32>
    %7 = vector.shape_cast %6 : vector<1x4x1xf32> to vector<4x1xf32>
    %8 = vector.broadcast %7 : vector<4x1xf32> to vector<4x128xf32>
    %9 = arith.addf %5, %8 : vector<4x128xf32>
    %c0_8 = arith.constant 0 : index
    %c0_9 = arith.constant 0 : index
    %c0_10 = arith.constant 0 : index
    %10 = vector.load %arg6[%c0_8, %c0_9, %c0_10] : memref<1x4x128xf32, #tpu.memory_space<vmem>>, vector<1x4x128xf32>
    %11 = vector.shape_cast %10 : vector<1x4x128xf32> to vector<4x128xf32>
    %12 = vector.shape_cast %9 : vector<4x128xf32> to vector<1x4x128xf32>
    tpu.vector_store %arg6[%c0_8, %c0_9, %c0_10], %12 {strides = array<i32>} : memref<1x4x128xf32, #tpu.memory_space<vmem>>, vector<1x4x128xf32>,
    return
  }
  func.func @transform_0(%arg0: i32, %arg1: i32, %arg2: i32) -> (i32, i32, i32) {
    %c0_i32 = arith.constant 0 : i32
    %c0_i32_0 = arith.constant 0 : i32
    return %arg0, %arg1, %c0_i32 : i32, i32, i32
  }
  func.func @transform_1(%arg0: i32, %arg1: i32, %arg2: i32) -> (i32, i32, i32) {
    %c0_i32 = arith.constant 0 : i32
    %c0_i32_0 = arith.constant 0 : i32
    return %arg0, %arg1, %c0_i32 : i32, i32, i32
  }
  func.func @transform_2(%arg0: i32, %arg1: i32, %arg2: i32) -> (i32, i32, i32) {
    %c0_i32 = arith.constant 0 : i32
    return %arg0, %arg1, %arg2 : i32, i32, i32
  }
  func.func @transform_3(%arg0: i32, %arg1: i32, %arg2: i32) -> (i32, i32, i32) {
    %c0_i32 = arith.constant 0 : i32
    return %arg0, %arg1, %arg2 : i32, i32, i32
  }
}

</mosaic_0001>

<bundles_post_ra>
// kernel: tpu_custom_call.1
= control target key start
LH: loop header
LB: loop body
LE: loop exit
PB: predicated region body
PF: predicated region fallthrough
CT: control target
= control target key end

     0   :  { %s775_s0 = inlined_call_operand.vmem [shape: f32[2,4,1], index: 0, kind: input, shape index: {}]   ;;  %s776_s1 = inlined_call_operand.vmem [shape: f32[2,4,1], index: 1, kind: input, shape index: {}]   ;;  %s777_s2 = inlined_call_operand.vmem [shape: f32[2,4,256], index: 2, kind: input, shape index: {}]   ;;  %s778_s3 = inlined_call_operand.hbm [shape: f32[2,4,256], index: 3, kind: output, shape index: {}]  }
   0x1   :  { %781 = sst [smem:[#allocation7_spill]] %s775_s0 }
   0x2   :  { %8 = vsyncpa [#allocation3], 0 }
   0x3   :  { %10 = vsyncpa [#allocation3 + $0x1], 0  ;;  %s632_s12 = smov 0   ;;  %s634_s13 = smov 0  }
   0x4   :  { %s636_s14 = smov 0   ;;  %s638_s15 = smov 0  }
   0x5   :  { %s640_s16 = smov 0   ;;  %s642_s17 = smov 0  }
   0x6   :  { %s644_s18 = smov 0   ;;  %s646_s19 = smov 0  }
   0x7 LB: > { %s426_s20 = sadd.s32 4294967295, %s608_s19   ;;  %s427_s21 = sadd.s32 4294967294, %s608_s19   ;;  %s608_s19 = sphi %s646_s19, %s16_s19   ;;  %s604_s18 = sphi %s644_s18, %s795_s18   ;;  %s600_s17 = sphi %s642_s17, %s794_s17   ;;  %s596_s16 = sphi %s640_s16, %s793_s16   ;;  %s592_s15 = sphi %s638_s15, %s792_s15   ;;  %s588_s14 = sphi %s636_s14, %s791_s14   ;;  %s584_s13 = sphi %s634_s13, %s790_s13   ;;  %s580_s12 = sphi %s632_s12, %s789_s12  }
   0x8   : > { %s28_s22 = sadd.s32 1, %s600_s17  ;;  %s35_s23 = sadd.s32 1, %s604_s18 }
   0x9   : > { %p29_p0 = scmp.ge.s32.totalorder %s28_s22, 2  ;;  %p142_p1 = scmp.ne.s32.totalorder %s588_s14, %s584_s13 }
   0xa   : > { %p143_p2 = scmp.eq.s32.totalorder %s426_s20, 3  ;;  %p148_p5 = scmp.ne.s32.totalorder %s584_s13, %s580_s12 }
   0xb   : > { %s797_s22 = smov (%p29_p0, %s28_s22), 0  ;;  %s799_s23 = smov (!%p29_p0, %s35_s23), %s604_s18 }
   0xc   : > { %782 = sst [smem:[#allocation5_spill]] %s797_s22  ;;  %s128_s24 = ssub.s32 %s600_s17, %s797_s22 }
   0xd   : > { %p683_p3 = por %p143_p2, %p142_p1  ;;  %p37_p4 = scmp.ge.s32.totalorder %s799_s23, 2 }
   0xe   : > { %p149_p6 = scmp.eq.s32.totalorder %s427_s21, 3  ;;  %p430_p7 = scmp.ge.s32.totalorder %s608_s19, 1 }
   0xf   : > { %s801_s23 = smov (%p37_p4, %s799_s23), 0  ;;  %p202_p9 = scmp.lt.s32.totalorder %s608_s19, 5 }
  0x10   : > { %784 = sst [smem:[#allocation6_spill]] %s801_s23  ;;  %p692_p8 = por %p149_p6, %p148_p5 }
  0x11   : > { %s125_s27 = ssub.s32 %s604_s18, %s801_s23  ;;  %s132_s28 = sadd.s32 1, %s588_s14 }
  0x12   : > { %s129_s29 = sor.u32 %s128_s24, %s125_s27  ;;  %p203_p10 = pnand %p430_p7, %p202_p9 }
  0x13   : > { %p130_p11 = scmp.eq.s32.totalorder %s129_s29, 0  ;;  %p247_p12 = scmp.lt.s32.totalorder (!%p203_p10), %s596_s16, 1  ;;  %v610_v0 = vmov (!%p203_p10), 0  }
  0x14   : > { %206 = sbr.rel (%p203_p10) target bundleno = 180 (0xb4), region = 32  ;;  %513 = vset.pattern.permute.xlu0 (!%p203_p10), %v610_v0  ;;  %s786_s0 = sld [smem:[#allocation7_spill]] (!%p203_p10) }
  0x15   : > { %s701_s30 = scalar_select %p130_p11, %s588_s14, %s132_s28  }
  0x16   : > { %p265_p13 = scmp.lt.s32.totalorder (!%p203_p10), %s592_s15, 1  ;;  %s244_s27 = sand.u32 (!%p203_p10), 1, %s584_s13  }
  0x17   : > { %s431_s29 = sshll.u32 (!%p203_p10), %s244_s27, 2  ;;  %s437_s23 = sshll.u32 (!%p203_p10), %s596_s16, 1 }
  0x1b   : > { %s248_s4 = scalar_select %p247_p12, %s596_s16, 1 }
  0x1c   : > { %s266_s20 = scalar_select %p265_p13, %s592_s15, 1 }
  0x1d   : > { %s432_s5 = sshll.u32 %s248_s4, 2  ;;  %s434_s21 = sshll.u32 %s248_s4, 1 }
  0x1e   : > { %s253_s8 = scalar_lea.vmem %s786_s0, %s432_s5  ;;  %s260_s11 = scalar_lea.vmem %s776_s1, %s432_s5 }
  0x1f   : > { %v274_v1 = vld [vmem:[%s253_s8] sm:$0xf]  ;;  %s270_s24 = sadd.s32 %s434_s21, %s266_s20  ;;  %s303_s0 = sadd.s32 %s592_s15, %s437_s23 }
  0x20   : > { %277 = vperm.xlu0 %513, %v274_v1   ;;  %v281_v2 = vld [vmem:[%s260_s11] sm:$0xf]  ;;  %s435_s28 = sshll.u32 %s270_s24, 2  ;;  %s438_s5 = sshll.u32 %s303_s0, 6 }
  0x21   : > { %s272_s7 = scalar_lea.vmem %s777_s2, %s435_s28  ;;  %s246_s8 = scalar_lea.vmem [#allocation2], %s431_s29 }
  0x22   : > { %v273_v3 = vld [vmem:[%s272_s7] sm:$0xf]  ;;  %s307_s9 = sshll.u32 %s246_s8, 4  ;;  %s722_s11 = scalar_lea.hbm %s778_s3, %s438_s5  ;;  %s724_s9 = int_to_ptr.vmem [resolvable:$true] %s307_s9 }
  0x23   : > { %s290_s15 = scalar_lea.sflag [#allocation3], %s244_s27  ;;  %s514_s16 = scalar_lea.vmem %s724_s9, 64 }
  0x24   : > { %284 = vperm.xlu0 %513, %v281_v2   ;;  %p515_p0 = scmp.ne.s32.totalorder %s724_s9, %s514_s16  ;;  %s611_s0 = smov [#allocation2]  }
  0x25   : > { %s518_s22 = sshll.u32 %s611_s0, 4  ;;  %s519_s22 = int_to_ptr.vmem [resolvable:$false] %s518_s22 }
  0x26   : > { %p516_p1 = pnand %p515_p0, %p683_p3  ;;  %s520_s23 = scalar_lea.vmem %s519_s22, 128 }
  0x27   : > { %p521_p4 = scmp.lt.s32.totalorder %s724_s9, %s519_s22  ;;  %p522_p5 = scmp.lt.s32.totalorder %s520_s23, %s514_s16 }
  0x28   : > { %p517_p2 = pneg %p516_p1 }
  0x29   : > { %p523_p6 = por %p522_p5, %p521_p4 }
  0x2b   : > { %p524_p7 = pnand %p523_p6, %p517_p2 }
  0x9f   : > { %v278_v4 = vpop.permute.xlu0 %277 }
  0xa0   : > { %v280_v5 = vmul.f32 %v278_v4, %v273_v3 }
  0xa3   : > { %v285_v6 = vpop.permute.xlu0 %284 }
  0xa4   : > { %v287_v7 = vadd.f32 %v285_v6, %v280_v5 }
  0xa6   : > { %288 = vst [vmem:[%s246_s8] sm:$0xf] %v287_v7 }
  0xa7   : > { %527 = shalt.err (!%p524_p7)
}
  0xa8   : > { %s528_s20 = scalar_lea.hbm %s722_s11, 64  ;;  %s532_s27 = scalar_lea.hbm %s778_s3, 256 }
  0xa9   : > { %p529_p9 = scmp.ne.s32.totalorder %s722_s11, %s528_s20  ;;  %p533_p12 = scmp.lt.u32.totalorder %s722_s11, %s778_s3 }
  0xaa   : > { %p534_p13 = scmp.lt.u32.totalorder %s532_s27, %s528_s20  ;;  %p536_p1 = scmp.lt.u32.totalorder %s528_s20, %s722_s11 }
  0xab   : > { %p530_p10 = pnand %p529_p9, %p683_p3 }
  0xac   : > { %p535_p0 = por %p534_p13, %p533_p12 }
  0xad   : > { %p531_p11 = pneg %p530_p10 }
  0xae   : > { %p537_p2 = por %p536_p1, %p535_p0 }
  0xb0   : > { %p538_p4 = pnand %p537_p2, %p531_p11 }
  0xb2   : > { %541 = shalt.err (!%p538_p4)
}
  0xb3   : > { %441 = dma.vmem_to_hbm [thread:$0]  (%p683_p3), %s724_s9, 64, %s722_s11, %s290_s15  }
  0xb4 PF: > { %p447_p5 = scmp.ge.s32.totalorder %s608_s19, 2  ;;  %s319_s6 = sand.u32 1, %s580_s12  }
  0xb5   : > { %s320_s7 = scalar_lea.sflag [#allocation3], %s319_s6 }
  0xb6   : > { %p444_p6 = pnand %p447_p5, %p692_p8 }
  0xb8   : > { %575 = dma.done.wait (!%p444_p6), %s320_s7, 64  }
  0xb9   : > { %577 = vsyncadd (!%p444_p6), %s320_s7, 4294967232  ;;  %s16_s19 = sadd.s32 1, %s608_s19   ;;  %s787_s25 = sld [smem:[#allocation5_spill]] }
  0xba   : > { %p13_p7 = scmp.ge.s32.totalorder %s16_s19, 6   ;;  %s788_s5 = sld [smem:[#allocation6_spill]] }
  0xbb   : > { %s789_s12 = smov %s584_s13  ;;  %s790_s13 = smov %s588_s14 }
  0xbc   : > { %s791_s14 = smov %s701_s30  ;;  %s792_s15 = smov %s600_s17 }
  0xbd   : > { %s793_s16 = smov %s604_s18  ;;  %15 = sbr.rel (!%p13_p7) target bundleno = 7 (0x7), region = 73 }
  0xbf   : > { %s794_s17 = smov %s787_s25 }
  0xc0   : > { %s795_s18 = smov %s788_s5 }
  0xc4   :  { %325 = vsyncpa [#allocation3], 1 }
  0xc5   :  { %327 = vsyncpa [#allocation3 + $0x1], 1 }

</bundles_post_ra>
